<compile_context>
chip_gen: v5e
topology: v5e:2x2
jax: 0.10.0
libtpu: 0.0.40
codegen_flags: <defaults>
</compile_context>

<pallas_src>
import functools

import jax
import jax.numpy as jnp
from jax import lax
from jax.experimental import pallas as pl
from jax.experimental.pallas import tpu as pltpu


def _basic_count_kernel(xt_ref, o_ref, acc_ref, *, n_examples, tile_n, inner_steps):
    """One (C, TILE_N) tile of the transposed input.

    xt_ref : (C, T) scores, classes on sublanes, examples on lanes.
    o_ref  : (1, C, 1) per-shard partial frequencies (written once, at finalize).
    acc_ref: (C, 1) f32 running per-class counts for this shard (VMEM scratch).
    """
    s = pl.program_id(0)      # parallel shard (megacore on v7x; serial elsewhere)
    j = pl.program_id(1)      # reduction step within the shard ("arbitrary")

    @pl.when(j == 0)
    def _():
        acc_ref[...] = jnp.zeros_like(acc_ref)

    xt = xt_ref[...]                                           # (C, T)
    C, T = xt.shape

    # Per-example max over the short class (sublane) axis.
    ex_max = jnp.max(xt, axis=0, keepdims=True)                # (1, T)
    is_max = xt == ex_max                                      # (C, T)

    # First-occurrence argmax (torch.argmax tie-break): min class id among maxima.
    # TODO(synk): all-NaN rows contribute nothing here; torch.argmax would return
    # the NaN's index.  Accepted divergence for this approximation.
    class_ids = lax.broadcasted_iota(jnp.int32, (C, T), 0)     # (C, T)
    amax = jnp.min(jnp.where(is_max, class_ids, jnp.int32(C)),
                   axis=0, keepdims=True)                      # (1, T)

    # Mask lanes past the true number of examples (ragged last tile / phantom
    # blocks of the parallel split).
    block_start = (s * inner_steps + j) * tile_n
    ex_ids = block_start + lax.broadcasted_iota(jnp.int32, (1, T), 1)
    valid = ex_ids < n_examples                                # (1, T)

    # Tie-broken one-hot, counted per class with one cross-lane (XLU) reduce.
    onehot = jnp.logical_and(class_ids == amax, valid)         # (C, T)
    acc_ref[...] += jnp.sum(onehot.astype(jnp.float32), axis=1, keepdims=True)

    @pl.when(j == pl.num_programs(1) - 1)
    def _():
        o_ref[0] = acc_ref[...] * jnp.float32(1.0 / n_examples)


def basic_count(x: jax.Array, n_classes: int, *, tile_n: int = 32768,
                num_splits: int = 2) -> jax.Array:
    """x: (n_examples, n_classes), any float dtype. Returns (n_classes,) float32."""
    N, C = x.shape
    assert C == n_classes, "input second dim must equal n_classes"

    # Lane-dense layout plumbing: examples on the 128-lane axis.  No dtype cast
    # in the wrapper — compute in the native dtype, accumulate counts in f32.
    xt = x.T                                                   # (C, N)

    # Tile sizing: budget ~4 MiB per input block (x2 double-buffer) so it fits
    # comfortably inside v7x's smaller scoped VMEM as well as v5e/v6e.
    c_pad = -(-C // 8) * 8
    itemsize = x.dtype.itemsize
    budget_tile = max(128, (4 * 1024 * 1024 // (c_pad * itemsize)) // 128 * 128)
    tile = min(tile_n, budget_tile)
    if N <= tile:
        tile = N                      # full-dim block, no 128-divisibility needed
    # else: tile is a multiple of 128 (lane constraint); last block is masked.

    total_blocks = pl.cdiv(N, tile)
    splits = max(1, min(num_splits, total_blocks))
    inner = pl.cdiv(total_blocks, splits)

    kernel = functools.partial(_basic_count_kernel, n_examples=N, tile_n=tile,
                               inner_steps=inner)

    cost = pl.CostEstimate(
        flops=6 * N * C,
        transcendentals=0,
        bytes_accessed=N * C * itemsize + splits * C * 4,
    )

    partial_freqs = pl.pallas_call(
        kernel,
        out_shape=jax.ShapeDtypeStruct((splits, C, 1), jnp.float32),
        grid_spec=pltpu.PrefetchScalarGridSpec(
            num_scalar_prefetch=0,
            grid=(splits, inner),
            in_specs=[pl.BlockSpec((C, tile), lambda s, j: (0, s * inner + j))],
            out_specs=pl.BlockSpec((1, C, 1), lambda s, j: (s, 0, 0)),
            scratch_shapes=[pltpu.VMEM((C, 1), jnp.float32)],
        ),
        compiler_params=pltpu.CompilerParams(
            dimension_semantics=("parallel", "arbitrary"),
        ),
        cost_estimate=cost,
    )(xt)

    # Sum the tiny per-shard partials (splits x C) in the wrapper.
    return jnp.sum(partial_freqs[:, :, 0], axis=0)


if __name__ == "__main__":
    key = jax.random.PRNGKey(0)

    # Small shape consistent with the module's forward: (n_examples, n_classes).
    n_examples, n_classes = 500, 8
    x = jax.random.normal(key, (n_examples, n_classes), dtype=jnp.float32)

    ref = (jnp.bincount(jnp.argmax(x, axis=1), length=n_classes)
           .astype(jnp.float32) / n_examples)

    # Path 1: tiled + 2-way parallel split (exercises grid, accumulator, mask).
    freqs_tiled = basic_count(x, n_classes, tile_n=128, num_splits=2)
    jax.block_until_ready(freqs_tiled)
    assert freqs_tiled.shape == (n_classes,)
    assert jnp.allclose(freqs_tiled, ref), (freqs_tiled, ref)

    # Path 2: default tile (single block, whole array fits).
    freqs_big = basic_count(x, n_classes)
    jax.block_until_ready(freqs_big)
    assert jnp.allclose(freqs_big, ref), (freqs_big, ref)

    print("KERNEL_OK")
</pallas_src>

<mosaic_0001>
module attributes {stable_mosaic.version = 11 : i64} {
  func.func @_basic_count_kernel(%arg0: i32, %arg1: i32, %arg2: memref<8x128xf32, #tpu.memory_space<vmem>>, %arg3: memref<1x8x1xf32, #tpu.memory_space<vmem>>, %arg4: memref<8x1xf32, #tpu.memory_space<vmem>>) attributes {dimension_semantics = [#tpu.dimension_semantics<parallel>, #tpu.dimension_semantics<arbitrary>], iteration_bounds = array<i64: 2, 2>, scalar_prefetch = 0 : i64, scratch_operands = 1 : i64, tpu.core_type = #tpu.core_type<tc>, window_params = [{transform_indices = @transform_0, window_bounds = array<i64: 8, 128>}, {transform_indices = @transform_1, window_bounds = array<i64: 1, 8, 1>}]} {
    %c0_i32 = arith.constant 0 : i32
    %0 = arith.cmpi eq, %arg1, %c0_i32 : i32
    %1 = arith.extui %0 : i1 to i32
    %c0_i32_0 = arith.constant 0 : i32
    %2 = arith.cmpi ne, %1, %c0_i32_0 : i32
    scf.if %2 {
      %cst_9 = arith.constant 0.000000e+00 : f32
      %35 = vector.broadcast %cst_9 : f32 to vector<8x1xf32>
      %c0_10 = arith.constant 0 : index
      %c0_11 = arith.constant 0 : index
      %36 = vector.load %arg4[%c0_10, %c0_11] : memref<8x1xf32, #tpu.memory_space<vmem>>, vector<8x1xf32>
      tpu.vector_store %arg4[%c0_10, %c0_11], %35 {strides = array<i32>} : memref<8x1xf32, #tpu.memory_space<vmem>>, vector<8x1xf32>,
    } else {
    }
    %c0 = arith.constant 0 : index
    %c0_1 = arith.constant 0 : index
    %3 = vector.load %arg2[%c0, %c0_1] : memref<8x128xf32, #tpu.memory_space<vmem>>, vector<8x128xf32>
    %cst = arith.constant dense<0xFF800000> : vector<128xf32>
    %4 = vector.multi_reduction <maximumf>, %3, %cst [0] : vector<8x128xf32> to vector<128xf32>
    %5 = vector.shape_cast %4 : vector<128xf32> to vector<1x128xf32>
    %6 = vector.broadcast %5 : vector<1x128xf32> to vector<8x128xf32>
    %7 = arith.cmpf oeq, %3, %6 : vector<8x128xf32>
    %8 = tpu.iota {dimensions = array<i32: 0>} : vector<8x128xi32>
    %c8_i32 = arith.constant 8 : i32
    %9 = vector.broadcast %c8_i32 : i32 to vector<8x128xi32>
    %10 = arith.select %7, %8, %9 : vector<8x128xi1>, vector<8x128xi32>
    %cst_2 = arith.constant dense<2147483647> : vector<128xi32>
    %11 = vector.multi_reduction <minsi>, %10, %cst_2 [0] : vector<8x128xi32> to vector<128xi32>
    %12 = vector.shape_cast %11 : vector<128xi32> to vector<1x128xi32>
    %c2_i32 = arith.constant 2 : i32
    %13 = arith.muli %arg0, %c2_i32 : i32
    %14 = arith.addi %13, %arg1 : i32
    %c128_i32 = arith.constant 128 : i32
    %15 = arith.muli %14, %c128_i32 : i32
    %16 = tpu.iota {dimensions = array<i32: 1>} : vector<1x128xi32>
    %17 = vector.broadcast %15 : i32 to vector<1x128xi32>
    %18 = arith.addi %17, %16 : vector<1x128xi32>
    %c500_i32 = arith.constant 500 : i32
    %19 = vector.broadcast %c500_i32 : i32 to vector<1x128xi32>
    %20 = arith.cmpi slt, %18, %19 : vector<1x128xi32>
    %21 = vector.broadcast %12 : vector<1x128xi32> to vector<8x128xi32>
    %22 = arith.cmpi eq, %8, %21 : vector<8x128xi32>
    %23 = vector.broadcast %20 : vector<1x128xi1> to vector<8x128xi1>
    %24 = arith.andi %22, %23 : vector<8x128xi1>
    %c0_3 = arith.constant 0 : index
    %c0_4 = arith.constant 0 : index
    %25 = vector.load %arg4[%c0_3, %c0_4] : memref<8x1xf32, #tpu.memory_space<vmem>>, vector<8x1xf32>
    %26 = arith.extui %24 : vector<8x128xi1> to vector<8x128xi32>
    %27 = arith.sitofp %26 : vector<8x128xi32> to vector<8x128xf32>
    %cst_5 = arith.constant dense<0.000000e+00> : vector<8xf32>
    %28 = vector.multi_reduction <add>, %27, %cst_5 [1] : vector<8x128xf32> to vector<8xf32>
    %29 = vector.shape_cast %28 : vector<8xf32> to vector<8x1xf32>
    %30 = arith.addf %25, %29 : vector<8x1xf32>
    %c0_6 = arith.constant 0 : index
    %c0_7 = arith.constant 0 : index
    %31 = vector.load %arg4[%c0_6, %c0_7] : memref<8x1xf32, #tpu.memory_space<vmem>>, vector<8x1xf32>
    tpu.vector_store %arg4[%c0_6, %c0_7], %30 {strides = array<i32>} : memref<8x1xf32, #tpu.memory_space<vmem>>, vector<8x1xf32>,
    %c1_i32 = arith.constant 1 : i32
    %32 = arith.cmpi eq, %arg1, %c1_i32 : i32
    %33 = arith.extui %32 : i1 to i32
    %c0_i32_8 = arith.constant 0 : i32
    %34 = arith.cmpi ne, %33, %c0_i32_8 : i32
    scf.if %34 {
      %c0_9 = arith.constant 0 : index
      %c0_10 = arith.constant 0 : index
      %35 = vector.load %arg4[%c0_9, %c0_10] : memref<8x1xf32, #tpu.memory_space<vmem>>, vector<8x1xf32>
      %cst_11 = arith.constant 2.000000e-03 : f32
      %36 = vector.broadcast %cst_11 : f32 to vector<8x1xf32>
      %37 = arith.mulf %35, %36 : vector<8x1xf32>
      %c0_12 = arith.constant 0 : index
      %c0_13 = arith.constant 0 : index
      %c0_14 = arith.constant 0 : index
      %38 = vector.load %arg3[%c0_12, %c0_13, %c0_14] : memref<1x8x1xf32, #tpu.memory_space<vmem>>, vector<1x8x1xf32>
      %39 = vector.shape_cast %38 : vector<1x8x1xf32> to vector<8x1xf32>
      %40 = vector.shape_cast %37 : vector<8x1xf32> to vector<1x8x1xf32>
      tpu.vector_store %arg3[%c0_12, %c0_13, %c0_14], %40 {strides = array<i32>} : memref<1x8x1xf32, #tpu.memory_space<vmem>>, vector<1x8x1xf32>,
    } else {
    }
    return
  }
  func.func @transform_0(%arg0: i32, %arg1: i32) -> (i32, i32) {
    %c2_i32 = arith.constant 2 : i32
    %0 = arith.muli %arg0, %c2_i32 : i32
    %1 = arith.addi %0, %arg1 : i32
    %c0_i32 = arith.constant 0 : i32
    %c0_i32_0 = arith.constant 0 : i32
    return %c0_i32, %1 : i32, i32
  }
  func.func @transform_1(%arg0: i32, %arg1: i32) -> (i32, i32, i32) {
    %c0_i32 = arith.constant 0 : i32
    %c0_i32_0 = arith.constant 0 : i32
    %c0_i32_1 = arith.constant 0 : i32
    return %arg0, %c0_i32, %c0_i32_0 : i32, i32, i32
  }
}

</mosaic_0001>

<bundles_post_ra>
// kernel: tpu_custom_call.1
= control target key start
LH: loop header
LB: loop body
LE: loop exit
PB: predicated region body
PF: predicated region fallthrough
CT: control target
= control target key end

     0   :  { %6 = vsyncpa [#allocation4], 0  ;;  %s605_s0 = inlined_call_operand.hbm [shape: f32[8,500], index: 0, kind: input, shape index: {}]   ;;  %s606_s1 = inlined_call_operand.vmem [shape: f32[2,8,1], index: 1, kind: output, shape index: {}]  }
   0x1   :  { %8 = vsyncpa [#allocation4 + $0x1], 0  ;;  %s487_s6 = smov 0   ;;  %s489_s7 = smov 0  }
   0x2   :  { %s491_s8 = smov 0   ;;  %s493_s9 = smov 0  }
   0x3   :  { %s495_s10 = smov 0   ;;  %s497_s11 = smov 0  }
   0x4   :  { %s499_s12 = smov 0   ;;  %s501_s13 = smov 0  }
   0x5 LB: > { %s285_s14 = sadd.s32 4294967295, %s473_s13   ;;  %s23_s15 = sadd.s32 1, %s465_s11  ;;  %s473_s13 = sphi %s501_s13, %s14_s13   ;;  %s469_s12 = sphi %s499_s12, %s615_s12   ;;  %s465_s11 = sphi %s497_s11, %s614_s11   ;;  %s461_s10 = sphi %s495_s10, %s613_s10   ;;  %s457_s9 = sphi %s493_s9, %s612_s9   ;;  %s453_s8 = sphi %s491_s8, %s611_s8   ;;  %s449_s7 = sphi %s489_s7, %s610_s7   ;;  %s445_s6 = sphi %s487_s6, %s609_s6  }
   0x6   : > { %p24_p0 = scmp.ge.s32.totalorder %s23_s15, 2  ;;  %s26_s16 = sadd.s32 1, %s469_s12 }
   0x7   : > { %s287_s17 = sshll.u32 %s469_s12, 1  ;;  %s37_s18 = sadd.s32 1, %s453_s8 }
   0x8   : > { %s617_s15 = smov (%p24_p0, %s23_s15), 0  ;;  %s619_s16 = smov (!%p24_p0, %s26_s16), %s469_s12 }
   0x9   : > { %s31_s19 = sadd.s32 %s465_s11, %s287_s17  ;;  %p44_p1 = scmp.ne.s32.totalorder %s453_s8, %s449_s7 }
   0xa   : > { %p28_p2 = scmp.ge.s32.totalorder %s619_s16, 2  ;;  %p45_p3 = scmp.eq.s32.totalorder %s473_s13, 0 }
   0xb   : > { %p50_p4 = scmp.ne.s32.totalorder %s449_s7, %s445_s6  ;;  %p51_p5 = scmp.eq.s32.totalorder %s285_s14, 0 }
   0xc   : > { %s621_s16 = smov (%p28_p2, %s619_s16), 0  ;;  %p540_p6 = por %p45_p3, %p44_p1 }
   0xd   : > { %p544_p7 = por %p51_p5, %p50_p4  ;;  %s288_s22 = sshll.u32 %s621_s16, 1 }
   0xe   : > { %s33_s23 = sadd.s32 %s288_s22, %s617_s15  ;;  %p310_p8 = scmp.lt.s32.totalorder %s473_s13, 4 }
   0xf   : > { %s34_s24 = ssub.s32 %s31_s19, %s33_s23  ;;  %s100_s25 = sand.u32 1, %s453_s8  }
  0x10   : > { %p35_p9 = scmp.eq.s32.totalorder %s34_s24, 0  ;;  %s291_s26 = sshll.u32 %s100_s25, 3 }
  0x11   : > { %s293_s27 = sshll.u32 %s31_s19, 3  ;;  %s104_s4 = scalar_lea.vmem [#allocation3], %s291_s26 }
  0x12   : > { %s553_s28 = scalar_select %p35_p9, %s453_s8, %s37_s18  }
  0x13   : > { %s110_s2 = scalar_lea.hbm %s605_s0, %s293_s27  ;;  %s114_s5 = sshll.u32 %s104_s4, 4  ;;  %s115_s5 = int_to_ptr.vmem [resolvable:$true] %s114_s5 }
  0x14   : > { %s112_s3 = sshll.u32 %s110_s2, 4  ;;  %p307_p10 = pnand %p310_p8, %p540_p6  ;;  %s113_s3 = int_to_ptr.hbm [resolvable:$true] %s112_s3 }
  0x15   : > { %p294_p11 = scmp.ge.s32.totalorder %s473_s13, 1  ;;  %p119_p12 = scmp.lt.s32.totalorder %s473_s13, 5 }
  0x16   : > { %s101_s6 = scalar_lea.sflag [#allocation4], %s100_s25 }
  0x17   : > { %309 = dma.hbm_to_vmem [thread:$0]  (!%p307_p10), %s113_s3, 128, %s115_s5, %s101_s6  }
  0x18   : > { %p120_p13 = pnand %p294_p11, %p119_p12 }
  0x19   : > { %s125_s14 = sand.u32 (!%p120_p13), 1, %s449_s7  }
  0x1a   : > { %123 = sbr.rel (%p120_p13) target bundleno = 201 (0xc9), region = 24  ;;  %s295_s17 = sshll.u32 (!%p120_p13), %s125_s14, 3 }
  0x1b   : > { %s126_s18 = scalar_lea.sflag (!%p120_p13), [#allocation4], %s125_s14  ;;  %s129_s19 = scalar_lea.vmem (!%p120_p13), [#allocation3], %s295_s17 }
  0x1f   : > { %440 = dma.done.wait (%p544_p7), %s126_s18, 128  }
  0x20   : > { %442 = vsyncadd (%p544_p7), %s126_s18, 4294967168  ;;  %p150_p0 = scmp.lt.s32.totalorder %s461_s10, 1  ;;  %p297_p1 = scmp.ne.s32.totalorder %s457_s9, 0 }
  0x22   : > { %s151_s20 = scalar_select %p150_p0, %s461_s10, 1 }
  0x23   : > { %157 = sbr.rel (%p297_p1) target bundleno = 42 (0x2a), region = 32 }
  0x24   : > { %s296_s22 = sshll.u32 %s151_s20, 3 }
  0x25   : > { %s574_s25 = scalar_lea.vmem %s606_s1, %s296_s22 }
  0x28   : > { %vm158_vm0 = vcmask 7168   ;;  %v475_v0 = vmov 0.0  }
  0x29   : > { %159 = vst.msk [vmem:[#allocation2] sm:$0xff] %vm158_vm0, %v475_v0 }
  0x2a PF: > { %v160_v1 = vld [vmem:[%s129_s19] sm:$0xff]  ;;  %v168_v5 = vlaneseq  ;;  %s298_s21 = sshll.u32 %s461_s10, 1  ;;  %v476_v20 = vmov 0.0   ;;  %vm198_vm8 = vcmask 7168   ;;  %p301_p2 = scmp.ne.s32.totalorder %s457_s9, 1 }
  0x2b   : > { %v161_v2 = vrot.slane %v160_v1, 4  ;;  %s181_s26 = sadd.s32 %s457_s9, %s298_s21 }
  0x2c   : > { %v169_v8 = vshrl.u32 %v168_v5, 7  ;;  %s299_s27 = sshll.u32 %s181_s26, 7  ;;  %v184_v12 = vand.u32 127, %v168_v5 }
  0x2d   : > { %v162_v3 = vmax.f32 %v160_v1, %v161_v2  ;;  %v185_v14 = vstv %s299_s27 }
  0x2e   : > { %v186_v16 = vadd.s32 %v185_v14, %v184_v12 }
  0x2f   : > { %v163_v4 = vrot.slane %v162_v3, 2 }
  0x30   : > { %vm187_vm5 = vcmp.lt.s32.totalorder %v186_v16, 500  ;;  %v192_v22 = vld [vmem:[#allocation2] sm:$0xff] }
  0x31   : > { %v164_v6 = vmax.f32 %v162_v3, %v163_v4 }
  0x33   : > { %v165_v7 = vrot.slane %v164_v6, 1 }
  0x35   : > { %v166_v9 = vmax.f32 %v164_v6, %v165_v7 }
  0x37   : > { %vm167_vm1 = vcmp.eq.f32.partialorder %v160_v1, %v166_v9 }
  0x38   : > { %v170_v10 = vsel %vm167_vm1, %v169_v8, 8 }
  0x39   : > { %v171_v11 = vrot.slane %v170_v10, 4 }
  0x3b   : > { %vm172_vm2 = vcmp.lt.s32.totalorder %v170_v10, %v171_v11 }
  0x3c   : > { %v173_v13 = vsel %vm172_vm2, %v170_v10, %v171_v11 }
  0x3d   : > { %v174_v15 = vrot.slane %v173_v13, 2 }
  0x3f   : > { %vm175_vm3 = vcmp.lt.s32.totalorder %v173_v13, %v174_v15 }
  0x40   : > { %v176_v17 = vsel %vm175_vm3, %v173_v13, %v174_v15 }
  0x41   : > { %v177_v18 = vrot.slane %v176_v17, 1 }
  0x43   : > { %vm178_vm4 = vcmp.lt.s32.totalorder %v176_v17, %v177_v18 }
  0x44   : > { %v179_v19 = vsel %vm178_vm4, %v176_v17, %v177_v18 }
  0x45   : > { %vm188_vm6 = vcmp.eq.s32.totalorder %v169_v8, %v179_v19 }
  0x46   : > { %vm191_vm7 = vmand %vm188_vm6, %vm187_vm5 }
  0x47   : > { %v300_v21 = vsel %vm191_vm7, 1.0, %v476_v20 }
  0x48   : > { %195 = vadd.xlane.f32.xlu0 %v300_v21 }
  0xba   : > { %203 = sbr.rel (%p301_p2) target bundleno = 201 (0xc9), region = 36 }
  0xbb   : > { %v196_v23 = vpop.xlane.xlu0 %195 }
  0xbc   : > { %v197_v24 = vadd.f32 %v196_v23, %v192_v22 }
  0xbe   : > { %199 = vst.msk [vmem:[#allocation2] sm:$0xff] %vm198_vm8, %v197_v24 }
  0xc5   : > { %v204_v25 = vld [vmem:[#allocation2] sm:$0xff] }
  0xc6   : > { %v205_v26 = vmul.f32 0.002, %v204_v25 }
  0xc8   : > { %206 = vst.msk [vmem:[%s574_s25] sm:$0xff] %vm198_vm8, %v205_v26 }
  0xc9 PF: > { %s14_s13 = sadd.s32 1, %s473_s13   ;;  %s609_s6 = smov %s449_s7 }
  0xca   : > { %p11_p3 = scmp.ge.s32.totalorder %s14_s13, 6   ;;  %s610_s7 = smov %s453_s8 }
  0xcb   : > { %s611_s8 = smov %s553_s28  ;;  %s612_s9 = smov %s465_s11 }
  0xcc   : > { %s613_s10 = smov %s469_s12  ;;  %s614_s11 = smov %s617_s15 }
  0xcd   : > { %s615_s12 = smov %s621_s16  ;;  %13 = sbr.rel (!%p11_p3) target bundleno = 5 (0x5), region = 72 }
  0xd2   :  { %226 = vsyncpa [#allocation4], 1 }
  0xd3   :  { %228 = vsyncpa [#allocation4 + $0x1], 1 }

</bundles_post_ra>
